<compile_context>
chip_gen: v5e
topology: v5e:2x2
jax: 0.10.0
libtpu: 0.0.40
codegen_flags: <defaults>
</compile_context>

<pallas_src>
import jax
import jax.numpy as jnp
from jax.experimental import pallas as pl
from jax.experimental.pallas import tpu as pltpu


def _round_up(x, m):
    return (x + m - 1) // m * m


# ---------------------------------------------------------------------------
# Pallas kernels: tiled matmul with fused (bias +) ReLU epilogue
# ---------------------------------------------------------------------------
# Single K-step variants (no reduction grid axis).
def _mm_relu_kernel(p_ref, w_ref, o_ref):
    o_ref[...] = jnp.maximum(
        jnp.dot(p_ref[...], w_ref[...], preferred_element_type=jnp.float32), 0.0)


def _mm_bias_relu_kernel(p_ref, w_ref, b_ref, o_ref):
    o_ref[...] = jnp.maximum(
        jnp.dot(p_ref[...], w_ref[...], preferred_element_type=jnp.float32)
        + b_ref[...], 0.0)


# Multi K-step variants: accumulate directly into the resident f32 output tile.
def _mm_relu_kacc_kernel(p_ref, w_ref, o_ref):
    kk = pl.program_id(2)

    @pl.when(kk == 0)
    def _():
        o_ref[...] = jnp.zeros_like(o_ref)

    o_ref[...] += jnp.dot(p_ref[...], w_ref[...],
                          preferred_element_type=jnp.float32)

    @pl.when(kk == pl.num_programs(2) - 1)
    def _():
        o_ref[...] = jnp.maximum(o_ref[...], 0.0)


def _mm_bias_relu_kacc_kernel(p_ref, w_ref, b_ref, o_ref):
    kk = pl.program_id(2)

    @pl.when(kk == 0)
    def _():
        o_ref[...] = jnp.zeros_like(o_ref)

    o_ref[...] += jnp.dot(p_ref[...], w_ref[...],
                          preferred_element_type=jnp.float32)

    @pl.when(kk == pl.num_programs(2) - 1)
    def _():
        o_ref[...] = jnp.maximum(o_ref[...] + b_ref[...], 0.0)


# ---------------------------------------------------------------------------
# Tile selection (v5e / v6e / v7x friendly)
# ---------------------------------------------------------------------------
_VMEM_BUDGET = 40 * 1024 * 1024  # leaves headroom inside v7x's 64 MiB physical


def _pick_tiles(M, K, O):
    Mp128 = _round_up(M, 128)
    Kp128 = _round_up(K, 128)
    Op128 = _round_up(O, 128)

    # N tile: 256 feeds the 2x256x256 MXU on v6e/v7x; 128 is fine on v5e and
    # for small O (and keeps padding waste down).
    tn = 256 if Op128 >= 256 else 128

    # K tile: 256-aligned when the reduction is big enough.
    if Kp128 <= 128:
        tk = 128
    elif Kp128 >= 512:
        tk = 512
    else:
        tk = 256

    # M tile: as big as fits the VMEM budget while keeping >=2 parallel grid
    # steps (so both v7x TensorCores get work).
    tm = 128
    for cand in (1024, 512, 256, 128):
        if cand > Mp128:
            continue
        n_parallel = (_round_up(M, cand) // cand) * (_round_up(O, tn) // tn)
        if n_parallel < 2 and cand > 128:
            continue
        # double-buffered bf16 input tiles + double-buffered f32 output tile
        vmem = 2 * (cand * tk + tk * tn) * 2 + 2 * cand * tn * 4
        if vmem <= _VMEM_BUDGET:
            tm = cand
            break
    return tm, tk, tn


# ---------------------------------------------------------------------------
# BasicConv forward: conv2d (+ optional bias) + ReLU, NCHW in / NCHW out
# ---------------------------------------------------------------------------
def basic_conv_pallas(x_nchw, w_oihw, bias=None, *, stride=(1, 1), padding=(0, 0)):
    if isinstance(stride, int):
        stride = (stride, stride)
    if isinstance(padding, int):
        padding = (padding, padding)
    sh, sw = stride
    ph, pw = padding

    N, C, H, W = x_nchw.shape
    O, Ci, kh, kw = w_oihw.shape
    assert Ci == C

    # NCHW -> NHWC, pad, and cast to bf16 ONCE before patch extraction so the
    # im2col intermediate is built/stored in bf16 (half the glue HBM traffic).
    x = jnp.transpose(x_nchw, (0, 2, 3, 1))
    xp = jnp.pad(x, ((0, 0), (ph, ph), (pw, pw), (0, 0))).astype(jnp.bfloat16)
    Hp, Wp = xp.shape[1], xp.shape[2]
    Ho = (Hp - kh) // sh + 1
    Wo = (Wp - kw) // sw + 1

    # im2col glue (plain JAX), bf16 throughout.
    cols = []
    for di in range(kh):
        for dj in range(kw):
            cols.append(xp[:, di:di + sh * Ho:sh, dj:dj + sw * Wo:sw, :])
    M = N * Ho * Wo
    K = kh * kw * C
    patches = jnp.stack(cols, axis=3).reshape(M, K)          # (M, K) bf16

    # weight (O, C, kh, kw) -> (kh, kw, C, O) -> (K, O), matching patch order
    wmat = jnp.transpose(w_oihw, (2, 3, 1, 0)).reshape(K, O).astype(jnp.bfloat16)

    tm, tk, tn = _pick_tiles(M, K, O)
    Mp = _round_up(M, tm)
    Kp = _round_up(K, tk)
    Op = _round_up(O, tn)

    patches = jnp.pad(patches, ((0, Mp - M), (0, Kp - K)))
    wmat = jnp.pad(wmat, ((0, Kp - K), (0, Op - O)))

    has_bias = bias is not None
    operands = [patches, wmat]
    if has_bias:
        bvec = jnp.pad(bias.astype(jnp.float32), (0, Op - O)).reshape(1, Op)
        operands.append(bvec)

    gi, gj, gk = Mp // tm, Op // tn, Kp // tk
    single_k = (gk == 1)

    # Honest cost estimate: A tile re-read per j, B tile re-read per i.
    cost = pl.CostEstimate(
        flops=2 * Mp * Kp * Op,
        transcendentals=0,
        bytes_accessed=Mp * Kp * 2 * gj + Kp * Op * 2 * gi + Mp * Op * 4,
    )

    vmem_need = 2 * (tm * tk + tk * tn) * 2 + 2 * tm * tn * 4 + (2 * tn * 4 if has_bias else 0)
    vmem_limit = int(min(48 * 1024 * 1024, max(4 * vmem_need, 16 * 1024 * 1024)))

    if single_k:
        grid = (gi, gj)
        in_specs = [
            pl.BlockSpec((tm, tk), lambda i, j: (i, 0)),
            pl.BlockSpec((tk, tn), lambda i, j: (0, j)),
        ]
        if has_bias:
            in_specs.append(pl.BlockSpec((1, tn), lambda i, j: (0, j)))
        out_spec = pl.BlockSpec((tm, tn), lambda i, j: (i, j))
        kernel = _mm_bias_relu_kernel if has_bias else _mm_relu_kernel
        dims = ("parallel", "parallel")
    else:
        grid = (gi, gj, gk)
        in_specs = [
            pl.BlockSpec((tm, tk), lambda i, j, k: (i, k)),
            pl.BlockSpec((tk, tn), lambda i, j, k: (k, j)),
        ]
        if has_bias:
            in_specs.append(pl.BlockSpec((1, tn), lambda i, j, k: (0, j)))
        out_spec = pl.BlockSpec((tm, tn), lambda i, j, k: (i, j))
        kernel = _mm_bias_relu_kacc_kernel if has_bias else _mm_relu_kacc_kernel
        dims = ("parallel", "parallel", "arbitrary")

    out = pl.pallas_call(
        kernel,
        out_shape=jax.ShapeDtypeStruct((Mp, Op), jnp.float32),
        grid_spec=pltpu.PrefetchScalarGridSpec(
            num_scalar_prefetch=0,
            grid=grid,
            in_specs=in_specs,
            out_specs=out_spec,
        ),
        compiler_params=pltpu.CompilerParams(
            dimension_semantics=dims,
            vmem_limit_bytes=vmem_limit,
        ),
        cost_estimate=cost,
    )(*operands)

    out = out[:M, :O].reshape(N, Ho, Wo, O)
    return jnp.transpose(out, (0, 3, 1, 2))  # back to NCHW


# ---------------------------------------------------------------------------
# Test
# ---------------------------------------------------------------------------
if __name__ == "__main__":
    key = jax.random.PRNGKey(0)
    kx, kwt, kb = jax.random.split(key, 3)

    # BasicConv(in_channels=4, out_channels=32, kernel_size=3, stride=1,
    #           padding=1, bias=False) on a (2, 4, 16, 16) NCHW input.
    N, C, H, W = 2, 4, 16, 16
    O, ksz = 32, 3
    stride, padding = 1, 1

    x = jax.random.normal(kx, (N, C, H, W), jnp.float32)
    scale = 1.0 / float((C * ksz * ksz) ** 0.5)
    w = jax.random.uniform(kwt, (O, C, ksz, ksz), jnp.float32, -scale, scale)

    # Reference uses the same bf16-quantized operands, f32 accumulation.
    xq = x.astype(jnp.bfloat16).astype(jnp.float32)
    wq = w.astype(jnp.bfloat16).astype(jnp.float32)

    def ref_conv(bias_vec):
        r = jax.lax.conv_general_dilated(
            xq, wq, (stride, stride),
            [(padding, padding), (padding, padding)],
            dimension_numbers=("NCHW", "OIHW", "NCHW"),
            precision=jax.lax.Precision.HIGHEST)
        if bias_vec is not None:
            r = r + bias_vec.reshape(1, O, 1, 1)
        return jnp.maximum(r, 0.0)

    # --- bias=False (BasicConv default) ---
    out = jax.block_until_ready(
        basic_conv_pallas(x, w, bias=None, stride=stride, padding=padding))
    assert out.shape == (N, O, H, W), out.shape
    ref = jax.block_until_ready(ref_conv(None))
    err = float(jnp.max(jnp.abs(out - ref)))
    assert jnp.allclose(out, ref, atol=2e-3, rtol=2e-3), err

    # --- bias=True path (exercises the bias kernel variant) ---
    b = jax.random.uniform(kb, (O,), jnp.float32, -scale, scale)
    out_b = jax.block_until_ready(
        basic_conv_pallas(x, w, bias=b, stride=stride, padding=padding))
    ref_b = jax.block_until_ready(ref_conv(b))
    err_b = float(jnp.max(jnp.abs(out_b - ref_b)))
    assert jnp.allclose(out_b, ref_b, atol=2e-3, rtol=2e-3), err_b

    print("KERNEL_OK")
</pallas_src>

<mosaic_0001>
module attributes {stable_mosaic.version = 11 : i64} {
  func.func @_mm_relu_kernel(%arg0: i32, %arg1: i32, %arg2: memref<256x128xbf16, #tpu.memory_space<vmem>>, %arg3: memref<128x128xbf16, #tpu.memory_space<vmem>>, %arg4: memref<256x128xf32, #tpu.memory_space<vmem>>) attributes {dimension_semantics = [#tpu.dimension_semantics<parallel>, #tpu.dimension_semantics<parallel>], iteration_bounds = array<i64: 2, 1>, scalar_prefetch = 0 : i64, scratch_operands = 0 : i64, tpu.core_type = #tpu.core_type<tc>, window_params = [{transform_indices = @transform_0, window_bounds = array<i64: 256, 128>}, {transform_indices = @transform_1, window_bounds = array<i64: 128, 128>}, {transform_indices = @transform_2, window_bounds = array<i64: 256, 128>}]} {
    %c0 = arith.constant 0 : index
    %c0_0 = arith.constant 0 : index
    %0 = vector.load %arg2[%c0, %c0_0] : memref<256x128xbf16, #tpu.memory_space<vmem>>, vector<256x128xbf16>
    %c0_1 = arith.constant 0 : index
    %c0_2 = arith.constant 0 : index
    %1 = vector.load %arg3[%c0_1, %c0_2] : memref<128x128xbf16, #tpu.memory_space<vmem>>, vector<128x128xbf16>
    %cst = arith.constant dense<0.000000e+00> : vector<256x128xf32>
    %2 = tpu.matmul %0, %1, %cst {dimension_numbers = #tpu.dot_dimension_numbers<[1], [0], [0], [1], [0, 0, 1, 1], [], []>} : vector<256x128xbf16>, vector<128x128xbf16>, vector<256x128xf32> -> vector<256x128xf32>
    %cst_3 = arith.constant 0.000000e+00 : f32
    %3 = vector.broadcast %cst_3 : f32 to vector<256x128xf32>
    %4 = arith.maximumf %2, %3 : vector<256x128xf32>
    %c0_4 = arith.constant 0 : index
    %c0_5 = arith.constant 0 : index
    %5 = vector.load %arg4[%c0_4, %c0_5] : memref<256x128xf32, #tpu.memory_space<vmem>>, vector<256x128xf32>
    tpu.vector_store %arg4[%c0_4, %c0_5], %4 {strides = array<i32>} : memref<256x128xf32, #tpu.memory_space<vmem>>, vector<256x128xf32>,
    return
  }
  func.func @transform_0(%arg0: i32, %arg1: i32) -> (i32, i32) {
    %c0_i32 = arith.constant 0 : i32
    %c0_i32_0 = arith.constant 0 : i32
    return %arg0, %c0_i32 : i32, i32
  }
  func.func @transform_1(%arg0: i32, %arg1: i32) -> (i32, i32) {
    %c0_i32 = arith.constant 0 : i32
    %c0_i32_0 = arith.constant 0 : i32
    return %c0_i32, %arg1 : i32, i32
  }
  func.func @transform_2(%arg0: i32, %arg1: i32) -> (i32, i32) {
    %c0_i32 = arith.constant 0 : i32
    return %arg0, %arg1 : i32, i32
  }
}

</mosaic_0001>

<bundles_post_ra>
// kernel: tpu_custom_call.1
= control target key start
LH: loop header
LB: loop body
LE: loop exit
PB: predicated region body
PF: predicated region fallthrough
CT: control target
= control target key end

     0   :  { %7 = vsyncpa [#allocation3], 0  ;;  %s1278_s0 = inlined_call_operand.hbm [shape: bf16[512,128], index: 0, kind: input, shape index: {}]   ;;  %s1279_s1 = inlined_call_operand.hbm [shape: bf16[128,128], index: 1, kind: input, shape index: {}]   ;;  %s1280_s2 = inlined_call_operand.hbm [shape: f32[512,128], index: 2, kind: output, shape index: {}]  }
   0x1   :  { %9 = vsyncpa [#allocation3 + $0x1], 0 }
   0x2   :  { %10 = vsyncpa [#allocation6], 0 }
   0x3   :  { %11 = vsyncpa [#allocation4], 0 }
   0x4   :  { %13 = vsyncpa [#allocation4 + $0x1], 0  ;;  %s1069_s9 = smov 0   ;;  %s1071_s10 = smov 0  }
   0x5   :  { %s1073_s11 = smov 0   ;;  %s1075_s12 = smov 0  }
   0x6   :  { %s1077_s13 = smov 0   ;;  %s1079_s14 = smov 0  }
   0x7 LB: > { %s661_s15 = sadd.s32 4294967295, %s1047_s14   ;;  %s662_s16 = sadd.s32 4294967294, %s1047_s14   ;;  %s1047_s14 = sphi %s1079_s14, %s19_s14   ;;  %s1043_s13 = sphi %s1077_s13, %s1292_s13   ;;  %s1039_s12 = sphi %s1075_s12, %s1291_s12   ;;  %s1035_s11 = sphi %s1073_s11, %s1290_s11   ;;  %s1031_s10 = sphi %s1071_s10, %s1289_s10   ;;  %s1027_s9 = sphi %s1069_s9, %s1288_s9  }
   0x8   : > { %p51_p0 = scmp.ne.s32.totalorder %s1031_s10, %s1027_s9  ;;  %p1103_p1 = scmp.eq.s32.totalorder %s661_s15, 0 }
   0x9   : > { %p1107_p2 = scmp.eq.s32.totalorder %s661_s15, 1  ;;  %p109_p3 = scmp.eq.s32.totalorder %s662_s16, 1 }
   0xa   : > { %p1113_p4 = por %p1103_p1, %p51_p0  ;;  %p663_p5 = scmp.ge.s32.totalorder %s1047_s14, 1 }
   0xb   : > { %p1118_p6 = por %p109_p3, %p51_p0  ;;  %p116_p7 = scmp.lt.s32.totalorder %s1047_s14, 3 }
   0xc   : > { %s129_s23 = sshll.u32 %s1279_s1, 4  ;;  %s1049_s25 = smov [#allocation5]   ;;  %s130_s23 = int_to_ptr.hbm [resolvable:$true] %s129_s23 }
   0xd   : > { %p1126_p8 = pnand %p663_p5, %p116_p7  ;;  %s131_s26 = sshll.u32 %s1049_s25, 4  ;;  %s132_s26 = int_to_ptr.vmem [resolvable:$true] %s131_s26 }
   0xe   : > { %p665_p11 = scmp.ge.s32.totalorder %s1047_s14, 2  ;;  %s1050_s27 = smov 64  }
   0xf   : > { %p832_p9 = pneg %p1126_p8  ;;  %s1051_s28 = smov 4  }
  0x10   : > { %s31_s29 = sadd.s32 1, %s1043_s13  ;;  %s38_s30 = sadd.s32 1, %s1035_s11 }
  0x11   : > { %p833_p10 = pnand %p832_p9, %p1103_p1  ;;  %p33_p12 = scmp.ge.s32.totalorder %s31_s29, 2 }
  0x12   : > { %p45_p13 = scmp.ne.s32.totalorder %s1035_s11, %s1031_s10  ;;  %p46_p0 = scmp.eq.s32.totalorder %s1047_s14, 0 }
  0x13   : > { %835 = dma.hbm_to_vmem [thread:$0]  (!%p833_p10), %s130_s23, 1024, %s132_s26, [#allocation6], %s1050_s27, %s1050_s27, %s1051_s28  }
  0x14   : > { %s1294_s29 = smov (%p33_p12, %s31_s29), 0  ;;  %p1145_p3 = por %p46_p0, %p45_p13 }
  0x15   : > { %p1151_p5 = por %p1107_p2, %p45_p13  ;;  %s35_s5 = ssub.s32 %s1043_s13, %s1294_s29 }
  0x16   : > { %p845_p7 = scmp.lt.s32.totalorder %s1047_s14, 2  ;;  %p36_p9 = scmp.eq.s32.totalorder %s35_s5, 0 }
  0x17   : > { %s145_s6 = sand.u32 1, %s1035_s11   ;;  %s774_s15 = sshll.u32 %s1043_s13, 7 }
  0x18   : > { %s666_s7 = sshll.u32 %s145_s6, 7  ;;  %s154_s22 = scalar_lea.hbm %s1278_s0, %s774_s15 }
  0x19   : > { %s1160_s8 = scalar_select %p36_p9, %s1035_s11, %s38_s30  }
  0x1a   : > { %s149_s23 = scalar_lea.vmem [#allocation2], %s666_s7  ;;  %s155_s18 = sshll.u32 %s154_s22, 4  ;;  %s156_s18 = int_to_ptr.hbm [resolvable:$true] %s155_s18 }
  0x1b   : > { %s157_s25 = sshll.u32 %s149_s23, 4  ;;  %p837_p2 = pnand %p845_p7, %p1145_p3  ;;  %s158_s25 = int_to_ptr.vmem [resolvable:$true] %s157_s25 }
  0x1c   : > { %s146_s26 = scalar_lea.sflag [#allocation3], %s145_s6  ;;  %169 = sbr.rel (%p1126_p8) target bundleno = 264 (0x108), region = 28 }
  0x1d   : > { %839 = dma.hbm_to_vmem [thread:$0]  (!%p837_p2), %s156_s18, 2048, %s158_s25, %s146_s26, %s1050_s27, %s1050_s27, %s1051_s28  }
  0x1e   : > { %s1174_s30 = sand.u32 (!%p1126_p8), 1, %s1031_s10  }
  0x1f   : > { %s670_s5 = sshll.u32 (!%p1126_p8), %s1174_s30, 7  ;;  %s172_s7 = scalar_lea.sflag (!%p1126_p8), [#allocation3], %s1174_s30 }
  0x20   : > { %s1178_s15 = scalar_lea.vmem (!%p1126_p8), [#allocation2], %s670_s5 }
  0x21   : > { %1014 = dma.done.wait (%p1113_p4), %s172_s7, 2048  }
  0x22   : > { %1016 = vsyncadd (%p1113_p4), %s172_s7, 4294965248 }
  0x23   : > { %1018 = dma.done.wait (%p1103_p1), [#allocation6], 1024  }
  0x24   : > { %1020 = vsyncadd (%p1103_p1), [#allocation6], 4294966272  ;;  %v798_v0 = vld [vmem:[#allocation5 + $0x38] sm:$0xff]  ;;  %v797_v1 = vld [vmem:[#allocation5 + $0x30] sm:$0xff]  ;;  %s672_s17 = sshll.u32 %s1174_s30, 8  ;;  %s799_s24 = sshll.u32 %s1039_s12, 8 }
  0x25   : > { %396 = vmatpush.bf16.msra.mxu0 %v798_v0  ;;  %800 = vmatpush.bf16.msra.mxu1 %v798_v0  ;;  %v796_v2 = vld [vmem:[#allocation5 + $0x28] sm:$0xff]  ;;  %v795_v3 = vld [vmem:[#allocation5 + $0x20] sm:$0xff]  ;;  %v794_v4 = vld [vmem:[#allocation5 + $0x18] sm:$0xff]  ;;  %s1205_s19 = scalar_lea.vmem [#allocation7], %s672_s17  ;;  %s562_s3 = scalar_lea.hbm %s1280_s2, %s799_s24 }
  0x26   : > { %801 = vmatpush.bf16.msra.mxu2 %v798_v0  ;;  %802 = vmatpush.bf16.msra.mxu3 %v798_v0  ;;  %v793_v5 = vld [vmem:[#allocation5 + $0x10] sm:$0xff]  ;;  %v792_v6 = vld [vmem:[#allocation5 + $0x8] sm:$0xff]  ;;  %v791_v7 = vld [vmem:[#allocation5] sm:$0xff]  ;;  %s563_s6 = sshll.u32 %s1205_s19, 4  ;;  %s565_s12 = sshll.u32 %s562_s3, 4  ;;  %s564_s6 = int_to_ptr.vmem [resolvable:$true] %s563_s6  ;;  %s566_s12 = int_to_ptr.hbm [resolvable:$true] %s565_s12 }
  0x27   : > { %v775_v8 = vld [vmem:[%s1178_s15] sm:$0xff]  ;;  %v776_v12 = vld [vmem:[%s1178_s15 + $0x8] sm:$0xff]  ;;  %v777_v16 = vld [vmem:[%s1178_s15 + $0x10] sm:$0xff]  ;;  %s550_s16 = scalar_lea.sflag [#allocation4], %s1174_s30  ;;  %s975_s21 = sshra.s32 %s566_s12, 4  ;;  %s976_s21 = int_to_ptr.hbm [resolvable:$true] %s975_s21 }
  0x28   : > { %v779_v9 = vld [vmem:[%s1178_s15 + $0x20] sm:$0xff]  ;;  %v780_v13 = vld [vmem:[%s1178_s15 + $0x28] sm:$0xff]  ;;  %v781_v17 = vld [vmem:[%s1178_s15 + $0x30] sm:$0xff]  ;;  %s977_s22 = scalar_lea.hbm %s976_s21, 256  ;;  %s981_s18 = scalar_lea.hbm %s1280_s2, 512 }
  0x29   : > { %397 = vmatpush.bf16.msra.mxu0 %v797_v1  ;;  %803 = vmatpush.bf16.msra.mxu1 %v797_v1  ;;  %v783_v10 = vld [vmem:[%s1178_s15 + $0x40] sm:$0xff]  ;;  %v784_v14 = vld [vmem:[%s1178_s15 + $0x48] sm:$0xff]  ;;  %v785_v18 = vld [vmem:[%s1178_s15 + $0x50] sm:$0xff]  ;;  %p978_p1 = scmp.ne.s32.totalorder %s976_s21, %s977_s22  ;;  %p982_p10 = scmp.lt.s32.totalorder %s976_s21, %s1280_s2 }
  0x2a   : > { %804 = vmatpush.bf16.msra.mxu2 %v797_v1  ;;  %805 = vmatpush.bf16.msra.mxu3 %v797_v1  ;;  %v787_v11 = vld [vmem:[%s1178_s15 + $0x60] sm:$0xff]  ;;  %v788_v15 = vld [vmem:[%s1178_s15 + $0x68] sm:$0xff]  ;;  %v789_v19 = vld [vmem:[%s1178_s15 + $0x70] sm:$0xff]  ;;  %p983_p12 = scmp.lt.s32.totalorder %s981_s18, %s977_s22 }
  0x2b   : > { %v778_v20 = vld [vmem:[%s1178_s15 + $0x18] sm:$0xff]  ;;  %p979_p4 = pnand %p978_p1, %p1151_p5 }
  0x2c   : > { %v782_v21 = vld [vmem:[%s1178_s15 + $0x38] sm:$0xff]  ;;  %p984_p13 = por %p983_p12, %p982_p10 }
  0x2d   : > { %398 = vmatpush.bf16.msra.mxu0 %v796_v2  ;;  %806 = vmatpush.bf16.msra.mxu1 %v796_v2  ;;  %v786_v22 = vld [vmem:[%s1178_s15 + $0x58] sm:$0xff]  ;;  %p980_p8 = pneg %p979_p4 }
  0x2e   : > { %807 = vmatpush.bf16.msra.mxu2 %v796_v2  ;;  %808 = vmatpush.bf16.msra.mxu3 %v796_v2  ;;  %v790_v23 = vld [vmem:[%s1178_s15 + $0x78] sm:$0xff] }
  0x2f   : > { %p985_p0 = pnand %p984_p13, %p980_p8 }
  0x31   : > { %399 = vmatpush.bf16.msra.mxu0 %v795_v3  ;;  %809 = vmatpush.bf16.msra.mxu1 %v795_v3 }
  0x32   : > { %810 = vmatpush.bf16.msra.mxu2 %v795_v3  ;;  %811 = vmatpush.bf16.msra.mxu3 %v795_v3 }
  0x35   : > { %400 = vmatpush.bf16.msra.mxu0 %v794_v4  ;;  %812 = vmatpush.bf16.msra.mxu1 %v794_v4 }
  0x36   : > { %813 = vmatpush.bf16.msra.mxu2 %v794_v4  ;;  %814 = vmatpush.bf16.msra.mxu3 %v794_v4 }
  0x39   : > { %401 = vmatpush.bf16.msra.mxu0 %v793_v5  ;;  %815 = vmatpush.bf16.msra.mxu1 %v793_v5 }
  0x3a   : > { %816 = vmatpush.bf16.msra.mxu2 %v793_v5  ;;  %817 = vmatpush.bf16.msra.mxu3 %v793_v5 }
  0x3d   : > { %402 = vmatpush.bf16.msra.mxu0 %v792_v6  ;;  %818 = vmatpush.bf16.msra.mxu1 %v792_v6 }
  0x3e   : > { %819 = vmatpush.bf16.msra.mxu2 %v792_v6  ;;  %820 = vmatpush.bf16.msra.mxu3 %v792_v6 }
  0x41   : > { %403 = vmatpush.bf16.msra.mxu0 %v791_v7  ;;  %821 = vmatpush.bf16.msra.mxu1 %v791_v7 }
  0x42   : > { %822 = vmatpush.bf16.msra.mxu2 %v791_v7  ;;  %823 = vmatpush.bf16.msra.mxu3 %v791_v7 }
  0x44   : > { %404 = vmatmul.bf16.vlgmr.msra.gmra.mxu0 %v775_v8  ;;  %424 = vmatmul.bf16.vlgmr.msra.gmra.mxu1 %v779_v9 }
  0x45   : > { %444 = vmatmul.bf16.vlgmr.msra.gmra.mxu2 %v783_v10  ;;  %464 = vmatmul.bf16.vlgmr.msra.gmra.mxu3 %v787_v11 }
  0x54   : > { %409 = vmatmul.bf16.gmra.mxu0 %v776_v12  ;;  %429 = vmatmul.bf16.gmra.mxu1 %v780_v13 }
  0x55   : > { %449 = vmatmul.bf16.gmra.mxu2 %v784_v14  ;;  %469 = vmatmul.bf16.gmra.mxu3 %v788_v15 }
  0x64   : > { %414 = vmatmul.bf16.gmra.mxu0 %v777_v16  ;;  %434 = vmatmul.bf16.gmra.mxu1 %v781_v17 }
  0x65   : > { %454 = vmatmul.bf16.gmra.mxu2 %v785_v18  ;;  %474 = vmatmul.bf16.gmra.mxu3 %v789_v19 }
  0x74   : > { %419 = vmatmul.bf16.gmra.mxu0 %v778_v20  ;;  %439 = vmatmul.bf16.gmra.mxu1 %v782_v21 }
  0x75   : > { %459 = vmatmul.bf16.gmra.mxu2 %v786_v22  ;;  %479 = vmatmul.bf16.gmra.mxu3 %v790_v23 }
  0xc1   : > { %v405_v24 = vpop.f32.mrf.mxu0  ;;  %v425_v25 = vpop.f32.mrf.mxu1 }
  0xc2   : > { %v485_v26 = vmax.f32 %v405_v24, 0.0  ;;  %v493_v27 = vmax.f32 %v425_v25, 0.0 }
  0xc4   : > { %517 = vst [vmem:[%s1205_s19] sm:$0xff] %v485_v26 }
  0xc5   : > { %525 = vst [vmem:[%s1205_s19 + $0x40] sm:$0xff] %v493_v27 }
  0xc8   : > { %v445_v28 = vpop.f32.mrf.mxu2  ;;  %v465_v29 = vpop.f32.mrf.mxu3 }
  0xc9   : > { %v501_v30 = vmax.f32 %v445_v28, 0.0  ;;  %v509_v31 = vmax.f32 %v465_v29, 0.0  ;;  %v407_v32 = vpop.f32.mrf.mxu0  ;;  %v427_v33 = vpop.f32.mrf.mxu1 }
  0xca   : > { %v486_v34 = vmax.f32 %v407_v32, 0.0  ;;  %v494_v35 = vmax.f32 %v427_v33, 0.0 }
  0xcb   : > { %533 = vst [vmem:[%s1205_s19 + $0x80] sm:$0xff] %v501_v30 }
  0xcc   : > { %541 = vst [vmem:[%s1205_s19 + $0xc0] sm:$0xff] %v509_v31 }
  0xcd   : > { %518 = vst [vmem:[%s1205_s19 + $0x8] sm:$0xff] %v486_v34 }
  0xce   : > { %526 = vst [vmem:[%s1205_s19 + $0x48] sm:$0xff] %v494_v35 }
  0xd0   : > { %v447_v36 = vpop.f32.mrf.mxu2  ;;  %v467_v37 = vpop.f32.mrf.mxu3 }
  0xd1   : > { %v502_v38 = vmax.f32 %v447_v36, 0.0  ;;  %v510_v39 = vmax.f32 %v467_v37, 0.0  ;;  %v410_v40 = vpop.f32.mrf.mxu0  ;;  %v430_v41 = vpop.f32.mrf.mxu1 }
  0xd2   : > { %v487_v42 = vmax.f32 %v410_v40, 0.0  ;;  %v495_v43 = vmax.f32 %v430_v41, 0.0 }
  0xd3   : > { %534 = vst [vmem:[%s1205_s19 + $0x88] sm:$0xff] %v502_v38 }
  0xd4   : > { %542 = vst [vmem:[%s1205_s19 + $0xc8] sm:$0xff] %v510_v39 }
  0xd5   : > { %519 = vst [vmem:[%s1205_s19 + $0x10] sm:$0xff] %v487_v42 }
  0xd6   : > { %527 = vst [vmem:[%s1205_s19 + $0x50] sm:$0xff] %v495_v43 }
  0xd8   : > { %v450_v44 = vpop.f32.mrf.mxu2  ;;  %v470_v45 = vpop.f32.mrf.mxu3 }
  0xd9   : > { %v503_v46 = vmax.f32 %v450_v44, 0.0  ;;  %v511_v47 = vmax.f32 %v470_v45, 0.0  ;;  %v412_v48 = vpop.f32.mrf.mxu0  ;;  %v432_v49 = vpop.f32.mrf.mxu1 }
  0xda   : > { %v488_v50 = vmax.f32 %v412_v48, 0.0  ;;  %v496_v51 = vmax.f32 %v432_v49, 0.0 }
  0xdb   : > { %535 = vst [vmem:[%s1205_s19 + $0x90] sm:$0xff] %v503_v46 }
  0xdc   : > { %543 = vst [vmem:[%s1205_s19 + $0xd0] sm:$0xff] %v511_v47 }
  0xdd   : > { %520 = vst [vmem:[%s1205_s19 + $0x18] sm:$0xff] %v488_v50 }
  0xde   : > { %528 = vst [vmem:[%s1205_s19 + $0x58] sm:$0xff] %v496_v51 }
  0xe0   : > { %v452_v52 = vpop.f32.mrf.mxu2  ;;  %v472_v53 = vpop.f32.mrf.mxu3 }
  0xe1   : > { %v504_v54 = vmax.f32 %v452_v52, 0.0  ;;  %v512_v55 = vmax.f32 %v472_v53, 0.0  ;;  %v415_v56 = vpop.f32.mrf.mxu0  ;;  %v435_v57 = vpop.f32.mrf.mxu1 }
  0xe2   : > { %v489_v58 = vmax.f32 %v415_v56, 0.0  ;;  %v497_v59 = vmax.f32 %v435_v57, 0.0 }
  0xe3   : > { %536 = vst [vmem:[%s1205_s19 + $0x98] sm:$0xff] %v504_v54 }
  0xe4   : > { %544 = vst [vmem:[%s1205_s19 + $0xd8] sm:$0xff] %v512_v55 }
  0xe5   : > { %521 = vst [vmem:[%s1205_s19 + $0x20] sm:$0xff] %v489_v58 }
  0xe6   : > { %529 = vst [vmem:[%s1205_s19 + $0x60] sm:$0xff] %v497_v59 }
  0xe8   : > { %v455_v60 = vpop.f32.mrf.mxu2  ;;  %v475_v61 = vpop.f32.mrf.mxu3 }
  0xe9   : > { %v505_v62 = vmax.f32 %v455_v60, 0.0  ;;  %v513_v63 = vmax.f32 %v475_v61, 0.0  ;;  %v417_v0 = vpop.f32.mrf.mxu0  ;;  %v437_v1 = vpop.f32.mrf.mxu1 }
  0xea   : > { %v490_v2 = vmax.f32 %v417_v0, 0.0  ;;  %v498_v3 = vmax.f32 %v437_v1, 0.0 }
  0xeb   : > { %537 = vst [vmem:[%s1205_s19 + $0xa0] sm:$0xff] %v505_v62 }
  0xec   : > { %545 = vst [vmem:[%s1205_s19 + $0xe0] sm:$0xff] %v513_v63 }
  0xed   : > { %522 = vst [vmem:[%s1205_s19 + $0x28] sm:$0xff] %v490_v2 }
  0xee   : > { %530 = vst [vmem:[%s1205_s19 + $0x68] sm:$0xff] %v498_v3 }
  0xf0   : > { %v457_v4 = vpop.f32.mrf.mxu2  ;;  %v477_v5 = vpop.f32.mrf.mxu3 }
  0xf1   : > { %v506_v6 = vmax.f32 %v457_v4, 0.0  ;;  %v514_v7 = vmax.f32 %v477_v5, 0.0  ;;  %v420_v8 = vpop.f32.mrf.mxu0  ;;  %v440_v9 = vpop.f32.mrf.mxu1 }
  0xf2   : > { %v491_v10 = vmax.f32 %v420_v8, 0.0  ;;  %v499_v11 = vmax.f32 %v440_v9, 0.0 }
  0xf3   : > { %538 = vst [vmem:[%s1205_s19 + $0xa8] sm:$0xff] %v506_v6 }
  0xf4   : > { %546 = vst [vmem:[%s1205_s19 + $0xe8] sm:$0xff] %v514_v7 }
  0xf5   : > { %523 = vst [vmem:[%s1205_s19 + $0x30] sm:$0xff] %v491_v10 }
  0xf6   : > { %531 = vst [vmem:[%s1205_s19 + $0x70] sm:$0xff] %v499_v11 }
  0xf8   : > { %v460_v12 = vpop.f32.mrf.mxu2  ;;  %v480_v13 = vpop.f32.mrf.mxu3 }
  0xf9   : > { %v507_v14 = vmax.f32 %v460_v12, 0.0  ;;  %v515_v15 = vmax.f32 %v480_v13, 0.0  ;;  %v422_v16 = vpop.f32.mrf.mxu0  ;;  %v442_v17 = vpop.f32.mrf.mxu1 }
  0xfa   : > { %v492_v18 = vmax.f32 %v422_v16, 0.0  ;;  %v500_v19 = vmax.f32 %v442_v17, 0.0 }
  0xfb   : > { %539 = vst [vmem:[%s1205_s19 + $0xb0] sm:$0xff] %v507_v14 }
  0xfc   : > { %547 = vst [vmem:[%s1205_s19 + $0xf0] sm:$0xff] %v515_v15 }
  0xfd   : > { %524 = vst [vmem:[%s1205_s19 + $0x38] sm:$0xff] %v492_v18 }
  0xfe   : > { %532 = vst [vmem:[%s1205_s19 + $0x78] sm:$0xff] %v500_v19 }
 0x100   : > { %v462_v20 = vpop.f32.mrf.mxu2  ;;  %v482_v21 = vpop.f32.mrf.mxu3 }
 0x101   : > { %v508_v22 = vmax.f32 %v462_v20, 0.0  ;;  %v516_v23 = vmax.f32 %v482_v21, 0.0 }
 0x103   : > { %540 = vst [vmem:[%s1205_s19 + $0xb8] sm:$0xff] %v508_v22 }
 0x104   : > { %548 = vst [vmem:[%s1205_s19 + $0xf8] sm:$0xff] %v516_v23 }
 0x105   : > { %988 = shalt.err (!%p985_p0)
}
 0x106   : > { %s1052_s30 = smov 128   ;;  %s1053_s7 = smov 8  }
 0x107   : > { %830 = dma.vmem_to_hbm [thread:$0]  (%p1151_p5), %s564_s6, 4096, %s566_s12, %s550_s16, %s1052_s30, %s1052_s30, %s1053_s7  }
 0x108 PF: > { %s580_s15 = sand.u32 1, %s1027_s9   ;;  %p841_p3 = pnand %p665_p11, %p1118_p6 }
 0x109   : > { %s581_s17 = scalar_lea.sflag [#allocation4], %s580_s15 }
 0x10a   : > { %p842_p7 = pneg %p841_p3 }
 0x10c   : > { %1022 = dma.done.wait (%p842_p7), %s581_s17, 4096  }
 0x10d   : > { %1024 = vsyncadd (%p842_p7), %s581_s17, 4294963200  ;;  %s19_s14 = sadd.s32 1, %s1047_s14   ;;  %s1288_s9 = smov %s1031_s10 }
 0x10e   : > { %p16_p9 = scmp.ge.s32.totalorder %s19_s14, 4   ;;  %s1289_s10 = smov %s1035_s11 }
 0x10f   : > { %s1290_s11 = smov %s1160_s8  ;;  %s1291_s12 = smov %s1043_s13 }
 0x110   : > { %s1292_s13 = smov %s1294_s29  ;;  %18 = sbr.rel (!%p16_p9) target bundleno = 7 (0x7), region = 78 }
 0x115   :  { %587 = vsyncpa [#allocation3], 1 }
 0x116   :  { %589 = vsyncpa [#allocation3 + $0x1], 1 }
 0x117   :  { %590 = vsyncpa [#allocation6], 1 }
 0x118   :  { %591 = vsyncpa [#allocation4], 1 }
 0x119   :  { %593 = vsyncpa [#allocation4 + $0x1], 1 }

</bundles_post_ra>
